<compile_context>
chip_gen: v7x
topology: tpu7x:2x2x1
jax: 0.10.0
libtpu: 0.0.40
codegen_flags: <defaults>
</compile_context>

<pallas_src>
import jax
import jax.numpy as jnp
import numpy as np
from jax.experimental import pallas as pl
from jax.experimental.pallas import tpu as pltpu


def _diffusion_kernel(a_ref, s_ref,             # (B*C, 1) f32 diffusion coefs (broadcast over lanes)
                      wx_ref, wl_ref,           # (B*C, B*C) f32 block-diagonal channel-mix weights
                      hr_ref, lru_ref,           # (B*C, T) bf16 image streams
                      mask_ref,                  # (B*C, T) int8 (0/1)
                      noise_ref,                 # (B*C, T) bf16
                      yup_ref,                   # (B*C, T) bf16  cond upsample + t-bias (precomputed)
                      x_tp1_ref, pred_ref,       # (B*C, T) bf16 outputs
                      loss_ref):                 # (1, T)   f32 per-lane |.| partial sums
    hr = hr_ref[...].astype(jnp.float32)
    lru = lru_ref[...].astype(jnp.float32)
    m = mask_ref[...].astype(jnp.float32)
    nz = noise_ref[...].astype(jnp.float32)

    # residual + masking (forward: residual_masked, low_res_up * mask)
    res_m = (hr - lru) * m
    lru_m = lru * m

    # NoiseScheduler.add_noise / q_sample  (per-batch coefs broadcast over lanes)
    x_tp1 = a_ref[...] * res_m + s_ref[...] * nz
    x_tp1_ref[...] = x_tp1.astype(x_tp1_ref.dtype)

    # denoise_fn stand-in: two block-diagonal channel matmuls (all batches in
    # one MXU call each) + precomputed conditioning/bias stream, then tanh.
    h = jnp.dot(wx_ref[...], x_tp1, preferred_element_type=jnp.float32)
    h = h + jnp.dot(wl_ref[...], lru_m, preferred_element_type=jnp.float32)
    pred = jnp.tanh(h + yup_ref[...].astype(jnp.float32))
    pred_ref[...] = pred.astype(pred_ref.dtype)

    # L1 partial sum: lane-wise (sublane reduce only); mean finished in JAX glue.
    # Loss uses the f32 pred (deliberate: matches the reference; the returned
    # noise_pred is the bf16-quantized copy).
    loss_ref[...] = jnp.sum(jnp.abs(nz - pred), axis=0, keepdims=True)


def init_params(key, c, c_cond, timesteps):
    k1, k2, k3, k4, k5 = jax.random.split(key, 5)
    scale = jnp.float32(0.1)
    params = {
        "w_x": scale * jax.random.normal(k1, (c, c), jnp.float32),
        "w_l": scale * jax.random.normal(k2, (c, c), jnp.float32),
        "w_c": scale * jax.random.normal(k3, (c, c_cond), jnp.float32),
        "w_rrdb": scale * jax.random.normal(k4, (c_cond, c), jnp.float32),
        "t_emb": scale * jax.random.normal(k5, (timesteps,), jnp.float32),
    }
    # NoiseScheduler(num_timesteps=timesteps, beta_schedule='linear',
    #                beta_start=1e-4, beta_end=0.02)
    betas = jnp.linspace(1e-4, 0.02, timesteps, dtype=jnp.float32)
    alphas_cumprod = jnp.cumprod(1.0 - betas)
    params["sqrt_ac"] = jnp.sqrt(alphas_cumprod)
    params["sqrt_1m_ac"] = jnp.sqrt(1.0 - alphas_cumprod)
    return params


def _rrdb_cond_low(params, low_res):
    # Stand-in for the external RRDB/ResNet conditioning net, evaluated at LOW
    # resolution only (tiny): 1x1 conv + ReLU, then the denoiser's w_c
    # projection.  The nearest-neighbour upsample to (H, W) commutes with 1x1
    # convs (and with adding the per-timestep bias), so everything expensive
    # stays at low resolution; the wrapper upsamples once and streams bf16.
    B, C, h, w = low_res.shape
    lr_flat = low_res.reshape(B, C, h * w)
    cond_low = jax.nn.relu(jnp.einsum("oc,bcp->bop", params["w_rrdb"], lr_flat))
    y_low = jnp.einsum("oc,bcp->bop", params["w_c"], cond_low)      # (B, C, h*w)
    return y_low.astype(jnp.float32)


def _choose_lane_tile(hw, max_tile=8192):
    # Largest lane tile (multiple of 128, <= max_tile) dividing hw such that
    # the number of grid steps is EVEN, so v7x's two TensorCores split the
    # 'parallel' axis evenly.  Falls back to the largest divisor otherwise.
    # Contract: hw must be a multiple of 128 (or <= 128, handled as one tile).
    if hw <= 128:
        return hw
    best_even, best_any = None, None
    tile = 128
    while tile <= min(max_tile, hw):
        if hw % tile == 0:
            best_any = tile
            if (hw // tile) % 2 == 0:
                best_even = tile
        tile += 128
    return best_even or best_any or hw


def gaussian_diffusion_forward(params, high_res, low_res, low_res_up, mask,
                               t=None, noise=None, key=None, lane_tile=None):
    """Mirrors GaussianDiffusion.forward: returns ({'q': loss}, (x_tp1, noise_pred), t)."""
    B, C, H, W = high_res.shape
    HW = H * W
    BC = B * C
    hl, wl = low_res.shape[2], low_res.shape[3]
    T = params["t_emb"].shape[0]
    assert H % hl == 0 and W % wl == 0

    if key is None:
        key = jax.random.PRNGKey(42)
    kt, kn = jax.random.split(key)
    if t is None:
        t = jax.random.randint(kt, (B,), 0, T)
    if noise is None:
        # TODO(synk): optionally generate noise in-kernel with pltpu.prng_seed /
        # prng_random_bits to drop this full-resolution HBM stream (RNG stream
        # would then differ from jax.random, so it stays an explicit input here).
        noise = jax.random.normal(kn, high_res.shape, jnp.float32)

    if lane_tile is None:
        lane_tile = _choose_lane_tile(HW)
    assert HW % lane_tile == 0 and (lane_tile % 128 == 0 or lane_tile == HW)
    n_tiles = HW // lane_tile

    # --- conditioning: everything expensive at low resolution, upsample once ---
    # Per-timestep bias folded into the low-res features (NN upsample of a
    # constant-shifted field == shifted upsample), so no per-batch scalar adds
    # remain on the kernel's hot path.
    y_low = _rrdb_cond_low(params, low_res)                          # (B, C, hl*wl) f32
    y_low = y_low + params["t_emb"][t][:, None, None]
    y_low4 = y_low.reshape(B, C, hl, wl)
    y_up_tb = jnp.repeat(jnp.repeat(y_low4, H // hl, axis=2), W // wl, axis=3)
    yup_b = y_up_tb.reshape(BC, HW).astype(jnp.bfloat16)

    # --- batched channel-mix weights: block-diagonal over B (one MXU dot each) ---
    eye_b = jnp.eye(B, dtype=jnp.float32)
    wx_blk = jnp.kron(eye_b, params["w_x"])                          # (B*C, B*C)
    wl_blk = jnp.kron(eye_b, params["w_l"])                          # (B*C, B*C)

    # --- per-batch diffusion coefficients as (B*C, 1) f32 columns ---
    a_col = jnp.repeat(params["sqrt_ac"][t], C).reshape(BC, 1).astype(jnp.float32)
    s_col = jnp.repeat(params["sqrt_1m_ac"][t], C).reshape(BC, 1).astype(jnp.float32)

    # --- image streams: bf16 (mask as int8); kernel upcasts to f32 for math ---
    to_bf16 = lambda x: x.reshape(BC, HW).astype(jnp.bfloat16)
    hr_b = to_bf16(high_res)
    lru_b = to_bf16(low_res_up)
    noise_b = to_bf16(noise)
    mask_i8 = mask.reshape(BC, HW).astype(jnp.int8)

    img_spec = pl.BlockSpec((BC, lane_tile), lambda j: (0, j))
    resident = lambda shape: pl.BlockSpec(shape, lambda j: (0, 0))

    cost = pl.CostEstimate(
        flops=int(2 * 2 * BC * BC * HW + 10 * BC * HW),
        transcendentals=int(BC * HW),
        bytes_accessed=int(4 * BC * HW * 2 + BC * HW * 1        # bf16 ins + int8 mask
                           + 2 * BC * HW * 2 + HW * 4           # bf16 outs + f32 loss
                           + 2 * BC * 4 + 2 * BC * BC * 4),
    )

    x_tp1_f, pred_f, loss_lanes = pl.pallas_call(
        _diffusion_kernel,
        out_shape=(
            jax.ShapeDtypeStruct((BC, HW), jnp.bfloat16),       # x_tp1
            jax.ShapeDtypeStruct((BC, HW), jnp.bfloat16),       # noise_pred
            jax.ShapeDtypeStruct((1, HW), jnp.float32),         # per-lane |.| sums
        ),
        grid_spec=pltpu.PrefetchScalarGridSpec(
            num_scalar_prefetch=0,
            grid=(n_tiles,),
            in_specs=[
                resident((BC, 1)),               # sqrt_ac[t] per row
                resident((BC, 1)),               # sqrt_1m_ac[t] per row
                resident((BC, BC)),              # Wx block-diagonal
                resident((BC, BC)),              # Wl block-diagonal
                img_spec,                        # high_res
                img_spec,                        # low_res_up
                img_spec,                        # mask (int8)
                img_spec,                        # noise
                img_spec,                        # y_up + t_bias
            ],
            out_specs=[
                img_spec,                        # x_tp1
                img_spec,                        # noise_pred
                pl.BlockSpec((1, lane_tile), lambda j: (0, j)),
            ],
        ),
        compiler_params=pltpu.CompilerParams(
            dimension_semantics=("parallel",),
            vmem_limit_bytes=32 * 1024 * 1024),
        cost_estimate=cost,
    )(a_col, s_col, wx_blk, wl_blk, hr_b, lru_b, mask_i8, noise_b, yup_b)

    loss = loss_lanes.sum() / (B * C * H * W)       # mean of |noise - pred|
    x_tp1 = x_tp1_f.reshape(B, C, H, W)
    noise_pred = pred_f.reshape(B, C, H, W)

    ret = {"q": loss}
    # TODO(synk): aux_l1_loss / aux_ssim_loss are gated by external hparams
    # flags and an external SSIM module; assumed disabled here.
    return ret, (x_tp1, noise_pred), t


def _reference_forward(params, high_res, low_res, low_res_up, mask, t, noise):
    """Pure-JAX reference matching the kernel semantics (for verification).

    Quantizes the image-sized streams to bf16 exactly as the kernel sees them.
    """
    B, C, H, W = high_res.shape
    hl, wl = low_res.shape[2], low_res.shape[3]
    q = lambda x: x.astype(jnp.bfloat16).astype(jnp.float32)
    hr, lru, nz = q(high_res), q(low_res_up), q(noise)
    m = mask.astype(jnp.float32)                        # 0/1 -> int8 round-trip is exact

    res_m = (hr - lru) * m
    lru_m = lru * m
    a = params["sqrt_ac"][t][:, None, None, None]
    s = params["sqrt_1m_ac"][t][:, None, None, None]
    tb = params["t_emb"][t][:, None, None, None]
    x_tp1 = a * res_m + s * nz

    y_low = _rrdb_cond_low(params, low_res).reshape(B, C, hl, wl)
    y_up = jnp.repeat(jnp.repeat(y_low, H // hl, axis=2), W // wl, axis=3)
    cond_tb = q(y_up + tb)                              # kernel streams this as bf16

    hp = jax.lax.Precision.HIGHEST
    pred = jnp.tanh(
        jnp.einsum("oc,bchw->bohw", params["w_x"], x_tp1, precision=hp)
        + jnp.einsum("oc,bchw->bohw", params["w_l"], lru_m, precision=hp)
        + cond_tb)
    loss = jnp.mean(jnp.abs(nz - pred))
    return loss, x_tp1, pred


if __name__ == "__main__":
    B, C, H, W = 2, 8, 16, 16
    hl, wl = 8, 8
    C_COND = 16
    TIMESTEPS = 5

    root = jax.random.PRNGKey(0)
    kp, khr, klr, kmask, kt, kn = jax.random.split(root, 6)

    params = init_params(kp, C, C_COND, TIMESTEPS)

    high_res = jax.random.normal(khr, (B, C, H, W), jnp.float32)
    low_res = jax.random.normal(klr, (B, C, hl, wl), jnp.float32)
    # nearest-neighbor upsample of low_res stands in for the bicubic upsample
    low_res_up = jnp.repeat(jnp.repeat(low_res, H // hl, axis=2), W // wl, axis=3)
    mask = (jax.random.uniform(kmask, (B, C, H, W)) > 0.3).astype(jnp.float32)
    t = jax.random.randint(kt, (B,), 0, TIMESTEPS)
    noise = jax.random.normal(kn, (B, C, H, W), jnp.float32)

    ret, (x_tp1, noise_pred), t_out = gaussian_diffusion_forward(
        params, high_res, low_res, low_res_up, mask, t=t, noise=noise)
    jax.block_until_ready((ret["q"], x_tp1, noise_pred, t_out))

    loss_ref, x_tp1_ref, pred_ref = _reference_forward(
        params, high_res, low_res, low_res_up, mask, t, noise)

    np.testing.assert_allclose(np.asarray(x_tp1.astype(jnp.float32)),
                               np.asarray(x_tp1_ref), rtol=2e-2, atol=2e-2)
    np.testing.assert_allclose(np.asarray(noise_pred.astype(jnp.float32)),
                               np.asarray(pred_ref), rtol=2e-2, atol=2e-2)
    np.testing.assert_allclose(np.asarray(ret["q"]), np.asarray(loss_ref),
                               rtol=1e-2, atol=1e-2)

    print("KERNEL_OK")
</pallas_src>

<mosaic_0001>
module attributes {stable_mosaic.version = 11 : i64} {
  func.func @_diffusion_kernel(%arg0: i32, %arg1: memref<16x1xf32, #tpu.memory_space<vmem>>, %arg2: memref<16x1xf32, #tpu.memory_space<vmem>>, %arg3: memref<16x16xf32, #tpu.memory_space<vmem>>, %arg4: memref<16x16xf32, #tpu.memory_space<vmem>>, %arg5: memref<16x128xbf16, #tpu.memory_space<vmem>>, %arg6: memref<16x128xbf16, #tpu.memory_space<vmem>>, %arg7: memref<16x128xi8, #tpu.memory_space<vmem>>, %arg8: memref<16x128xbf16, #tpu.memory_space<vmem>>, %arg9: memref<16x128xbf16, #tpu.memory_space<vmem>>, %arg10: memref<16x128xbf16, #tpu.memory_space<vmem>>, %arg11: memref<16x128xbf16, #tpu.memory_space<vmem>>, %arg12: memref<1x128xf32, #tpu.memory_space<vmem>>) attributes {dimension_semantics = [#tpu.dimension_semantics<parallel>], iteration_bounds = array<i64: 2>, scalar_prefetch = 0 : i64, scratch_operands = 0 : i64, tpu.core_type = #tpu.core_type<tc>, window_params = [{pipeline_mode = #tpu.pipeline_mode<synchronous>, transform_indices = @transform_0, window_bounds = array<i64: 16, 1>}, {pipeline_mode = #tpu.pipeline_mode<synchronous>, transform_indices = @transform_1, window_bounds = array<i64: 16, 1>}, {pipeline_mode = #tpu.pipeline_mode<synchronous>, transform_indices = @transform_2, window_bounds = array<i64: 16, 16>}, {pipeline_mode = #tpu.pipeline_mode<synchronous>, transform_indices = @transform_3, window_bounds = array<i64: 16, 16>}, {transform_indices = @transform_4, window_bounds = array<i64: 16, 128>}, {transform_indices = @transform_5, window_bounds = array<i64: 16, 128>}, {transform_indices = @transform_6, window_bounds = array<i64: 16, 128>}, {transform_indices = @transform_7, window_bounds = array<i64: 16, 128>}, {transform_indices = @transform_8, window_bounds = array<i64: 16, 128>}, {transform_indices = @transform_9, window_bounds = array<i64: 16, 128>}, {transform_indices = @transform_10, window_bounds = array<i64: 16, 128>}, {transform_indices = @transform_11, window_bounds = array<i64: 1, 128>}]} {
    %c0 = arith.constant 0 : index
    %c0_0 = arith.constant 0 : index
    %0 = vector.load %arg5[%c0, %c0_0] : memref<16x128xbf16, #tpu.memory_space<vmem>>, vector<16x128xbf16>
    %1 = arith.extf %0 : vector<16x128xbf16> to vector<16x128xf32>
    %c0_1 = arith.constant 0 : index
    %c0_2 = arith.constant 0 : index
    %2 = vector.load %arg6[%c0_1, %c0_2] : memref<16x128xbf16, #tpu.memory_space<vmem>>, vector<16x128xbf16>
    %3 = arith.extf %2 : vector<16x128xbf16> to vector<16x128xf32>
    %c0_3 = arith.constant 0 : index
    %c0_4 = arith.constant 0 : index
    %4 = vector.load %arg7[%c0_3, %c0_4] : memref<16x128xi8, #tpu.memory_space<vmem>>, vector<16x128xi8>
    %5 = arith.sitofp %4 : vector<16x128xi8> to vector<16x128xf32>
    %c0_5 = arith.constant 0 : index
    %c0_6 = arith.constant 0 : index
    %6 = vector.load %arg8[%c0_5, %c0_6] : memref<16x128xbf16, #tpu.memory_space<vmem>>, vector<16x128xbf16>
    %7 = arith.extf %6 : vector<16x128xbf16> to vector<16x128xf32>
    %8 = arith.subf %1, %3 : vector<16x128xf32>
    %9 = arith.mulf %8, %5 : vector<16x128xf32>
    %10 = arith.mulf %3, %5 : vector<16x128xf32>
    %c0_7 = arith.constant 0 : index
    %c0_8 = arith.constant 0 : index
    %11 = vector.load %arg1[%c0_7, %c0_8] : memref<16x1xf32, #tpu.memory_space<vmem>>, vector<16x1xf32>
    %12 = vector.broadcast %11 : vector<16x1xf32> to vector<16x128xf32>
    %13 = arith.mulf %12, %9 : vector<16x128xf32>
    %c0_9 = arith.constant 0 : index
    %c0_10 = arith.constant 0 : index
    %14 = vector.load %arg2[%c0_9, %c0_10] : memref<16x1xf32, #tpu.memory_space<vmem>>, vector<16x1xf32>
    %15 = vector.broadcast %14 : vector<16x1xf32> to vector<16x128xf32>
    %16 = arith.mulf %15, %7 : vector<16x128xf32>
    %17 = arith.addf %13, %16 : vector<16x128xf32>
    %18 = arith.truncf %17 : vector<16x128xf32> to vector<16x128xbf16>
    %c0_11 = arith.constant 0 : index
    %c0_12 = arith.constant 0 : index
    %19 = vector.load %arg10[%c0_11, %c0_12] : memref<16x128xbf16, #tpu.memory_space<vmem>>, vector<16x128xbf16>
    tpu.vector_store %arg10[%c0_11, %c0_12], %18 {strides = array<i32>} : memref<16x128xbf16, #tpu.memory_space<vmem>>, vector<16x128xbf16>,
    %c0_13 = arith.constant 0 : index
    %c0_14 = arith.constant 0 : index
    %20 = vector.load %arg3[%c0_13, %c0_14] : memref<16x16xf32, #tpu.memory_space<vmem>>, vector<16x16xf32>
    %cst = arith.constant dense<0.000000e+00> : vector<16x128xf32>
    %21 = tpu.matmul %20, %17, %cst {dimension_numbers = #tpu.dot_dimension_numbers<[1], [0], [0], [1], [0, 0, 1, 1], [], []>} : vector<16x16xf32>, vector<16x128xf32>, vector<16x128xf32> -> vector<16x128xf32>
    %c0_15 = arith.constant 0 : index
    %c0_16 = arith.constant 0 : index
    %22 = vector.load %arg4[%c0_15, %c0_16] : memref<16x16xf32, #tpu.memory_space<vmem>>, vector<16x16xf32>
    %cst_17 = arith.constant dense<0.000000e+00> : vector<16x128xf32>
    %23 = tpu.matmul %22, %10, %cst_17 {dimension_numbers = #tpu.dot_dimension_numbers<[1], [0], [0], [1], [0, 0, 1, 1], [], []>} : vector<16x16xf32>, vector<16x128xf32>, vector<16x128xf32> -> vector<16x128xf32>
    %24 = arith.addf %21, %23 : vector<16x128xf32>
    %c0_18 = arith.constant 0 : index
    %c0_19 = arith.constant 0 : index
    %25 = vector.load %arg9[%c0_18, %c0_19] : memref<16x128xbf16, #tpu.memory_space<vmem>>, vector<16x128xbf16>
    %26 = arith.extf %25 : vector<16x128xbf16> to vector<16x128xf32>
    %27 = arith.addf %24, %26 : vector<16x128xf32>
    %28 = math.tanh %27 : vector<16x128xf32>
    %29 = arith.truncf %28 : vector<16x128xf32> to vector<16x128xbf16>
    %c0_20 = arith.constant 0 : index
    %c0_21 = arith.constant 0 : index
    %30 = vector.load %arg11[%c0_20, %c0_21] : memref<16x128xbf16, #tpu.memory_space<vmem>>, vector<16x128xbf16>
    tpu.vector_store %arg11[%c0_20, %c0_21], %29 {strides = array<i32>} : memref<16x128xbf16, #tpu.memory_space<vmem>>, vector<16x128xbf16>,
    %31 = arith.subf %7, %28 : vector<16x128xf32>
    %32 = math.absf %31 : vector<16x128xf32>
    %cst_22 = arith.constant dense<0.000000e+00> : vector<128xf32>
    %33 = vector.multi_reduction <add>, %32, %cst_22 [0] : vector<16x128xf32> to vector<128xf32>
    %34 = vector.shape_cast %33 : vector<128xf32> to vector<1x128xf32>
    %c0_23 = arith.constant 0 : index
    %c0_24 = arith.constant 0 : index
    %35 = vector.load %arg12[%c0_23, %c0_24] : memref<1x128xf32, #tpu.memory_space<vmem>>, vector<1x128xf32>
    tpu.vector_store %arg12[%c0_23, %c0_24], %34 {strides = array<i32>} : memref<1x128xf32, #tpu.memory_space<vmem>>, vector<1x128xf32>,
    return
  }
  func.func @transform_0(%arg0: i32) -> (i32, i32) {
    %c0_i32 = arith.constant 0 : i32
    %c0_i32_0 = arith.constant 0 : i32
    %c0_i32_1 = arith.constant 0 : i32
    return %c0_i32, %c0_i32_0 : i32, i32
  }
  func.func @transform_1(%arg0: i32) -> (i32, i32) {
    %c0_i32 = arith.constant 0 : i32
    %c0_i32_0 = arith.constant 0 : i32
    %c0_i32_1 = arith.constant 0 : i32
    return %c0_i32, %c0_i32_0 : i32, i32
  }
  func.func @transform_2(%arg0: i32) -> (i32, i32) {
    %c0_i32 = arith.constant 0 : i32
    %c0_i32_0 = arith.constant 0 : i32
    %c0_i32_1 = arith.constant 0 : i32
    return %c0_i32, %c0_i32_0 : i32, i32
  }
  func.func @transform_3(%arg0: i32) -> (i32, i32) {
    %c0_i32 = arith.constant 0 : i32
    %c0_i32_0 = arith.constant 0 : i32
    %c0_i32_1 = arith.constant 0 : i32
    return %c0_i32, %c0_i32_0 : i32, i32
  }
  func.func @transform_4(%arg0: i32) -> (i32, i32) {
    %c0_i32 = arith.constant 0 : i32
    %c0_i32_0 = arith.constant 0 : i32
    return %c0_i32, %arg0 : i32, i32
  }
  func.func @transform_5(%arg0: i32) -> (i32, i32) {
    %c0_i32 = arith.constant 0 : i32
    %c0_i32_0 = arith.constant 0 : i32
    return %c0_i32, %arg0 : i32, i32
  }
  func.func @transform_6(%arg0: i32) -> (i32, i32) {
    %c0_i32 = arith.constant 0 : i32
    %c0_i32_0 = arith.constant 0 : i32
    return %c0_i32, %arg0 : i32, i32
  }
  func.func @transform_7(%arg0: i32) -> (i32, i32) {
    %c0_i32 = arith.constant 0 : i32
    %c0_i32_0 = arith.constant 0 : i32
    return %c0_i32, %arg0 : i32, i32
  }
  func.func @transform_8(%arg0: i32) -> (i32, i32) {
    %c0_i32 = arith.constant 0 : i32
    %c0_i32_0 = arith.constant 0 : i32
    return %c0_i32, %arg0 : i32, i32
  }
  func.func @transform_9(%arg0: i32) -> (i32, i32) {
    %c0_i32 = arith.constant 0 : i32
    %c0_i32_0 = arith.constant 0 : i32
    return %c0_i32, %arg0 : i32, i32
  }
  func.func @transform_10(%arg0: i32) -> (i32, i32) {
    %c0_i32 = arith.constant 0 : i32
    %c0_i32_0 = arith.constant 0 : i32
    return %c0_i32, %arg0 : i32, i32
  }
  func.func @transform_11(%arg0: i32) -> (i32, i32) {
    %c0_i32 = arith.constant 0 : i32
    %c0_i32_0 = arith.constant 0 : i32
    return %c0_i32, %arg0 : i32, i32
  }
}

</mosaic_0001>

<bundles_post_ra>
// kernel: tpu_custom_call.1
= control target key start
LH: loop header
LB: loop body
LE: loop exit
PB: predicated region body
PF: predicated region fallthrough
CT: control target
= control target key end

     0   :  { %s1985_s0 = inlined_call_operand.vmem [shape: f32[16,1], index: 0, kind: input, shape index: {}]   ;;  %s1986_s1 = inlined_call_operand.vmem [shape: f32[16,1], index: 1, kind: input, shape index: {}]   ;;  %s1987_s2 = inlined_call_operand.vmem [shape: f32[16,16], index: 2, kind: input, shape index: {}]   ;;  %s1988_s3 = inlined_call_operand.vmem [shape: f32[16,16], index: 3, kind: input, shape index: {}]   ;;  %s1989_s4 = inlined_call_operand.vmem [shape: bf16[16,256], index: 4, kind: input, shape index: {}]   ;;  %s1990_s5 = inlined_call_operand.hbm [shape: bf16[16,256], index: 5, kind: input, shape index: {}]   ;;  %s1991_s6 = inlined_call_operand.hbm [shape: s8[16,256], index: 6, kind: input, shape index: {}]   ;;  %s1992_s7 = inlined_call_operand.hbm [shape: bf16[16,256], index: 7, kind: input, shape index: {}]   ;;  %s1993_s8 = inlined_call_operand.vmem [shape: bf16[16,256], index: 8, kind: input, shape index: {}]   ;;  %s1994_s9 = inlined_call_operand.hbm [shape: bf16[16,256], index: 9, kind: output, shape index: {0}]   ;;  %s1995_s10 = inlined_call_operand.hbm [shape: bf16[16,256], index: 10, kind: output, shape index: {1}]   ;;  %s1996_s11 = inlined_call_operand.hbm [shape: f32[1,256], index: 11, kind: output, shape index: {2}]  }
   0x1   :  { %2005 = sst [smem:[#allocation23_spill]] %s1989_s4 }
   0x2   :  { %2006 = sst [smem:[#allocation24_spill]] %s1990_s5 }
   0x3   :  { %2007 = sst [smem:[#allocation25_spill]] %s1991_s6 }
   0x4   :  { %17 = vsyncpa [#allocation4], 0 }
   0x5   :  { %19 = vsyncpa [#allocation4 + $0x1], 0 }
   0x6   :  { %20 = vsyncpa [#allocation7], 0 }
   0x7   :  { %22 = vsyncpa [#allocation7 + $0x1], 0 }
   0x8   :  { %23 = vsyncpa [#allocation5], 0 }
   0x9   :  { %25 = vsyncpa [#allocation5 + $0x1], 0 }
   0xa   :  { %26 = vsyncpa [#allocation12], 0 }
   0xb   :  { %28 = vsyncpa [#allocation12 + $0x1], 0  ;;  %s1609_s17 = smov 0   ;;  %s1611_s18 = smov 0  }
   0xc   :  { %s1613_s19 = smov 0   ;;  %s1615_s20 = smov 0  }
   0xd LB: > { %2008 = sst [smem:[#allocation18_spill]] %s1520_s17  ;;  %s1630_s21 = sadd.s32 4294967295, %s1532_s20   ;;  %s1532_s20 = sphi %s1615_s20, %s2026_s20   ;;  %s1528_s19 = sphi %s1613_s19, %s2028_s19   ;;  %s1524_s18 = sphi %s1611_s18, %s2030_s18   ;;  %s1520_s17 = sphi %s1609_s17, %s2029_s17  }
   0xe   : > { %2009 = sst [smem:[#allocation19_spill]] %s1528_s19  ;;  %s1997_s22 = sadd.s32 4294967294, %s1532_s20  }
   0xf   : > { %s1634_s23 = sadd.s32 1, %s1532_s20   ;;  %s125_s24 = sadd.s32 1, %s1528_s19 }
  0x10   : > { %2010 = sst [smem:[#allocation20_spill]] %s1634_s23  ;;  %s122_s25 = ssub.s32 %s1532_s20, %s1634_s23 }
  0x11   : > { %p132_p0 = scmp.ne.s32.totalorder %s1528_s19, %s1524_s18  ;;  %p123_p1 = scmp.eq.s32.totalorder %s122_s25, 0 }
  0x12   : > { %p133_p2 = scmp.eq.s32.totalorder %s1532_s20, 0  ;;  %p164_p3 = scmp.ne.s32.totalorder %s1524_s18, %s1520_s17 }
  0x13   : > { %p165_p4 = scmp.eq.s32.totalorder %s1630_s21, 0  ;;  %p266_p7 = scmp.eq.s32.totalorder %s1630_s21, 1 }
  0x14   : > { %s1646_s26 = scalar_select %p123_p1, %s1528_s19, %s125_s24  }
  0x15   : > { %p1648_p5 = por %p133_p2, %p132_p0  ;;  %p1652_p6 = por %p165_p4, %p164_p3 }
  0x16   : > { %2011 = sst [smem:[#allocation21_spill]] %s1646_s26  ;;  %p272_p8 = scmp.eq.s32.totalorder %s1997_s22, 1 }
  0x17   : > { %p1659_p9 = por %p266_p7, %p132_p0  ;;  %p2002_p11 = scmp.ge.s32.totalorder %s1532_s20, 2 }
  0x18   : > { %p1663_p10 = por %p272_p8, %p164_p3 }
  0x19   : > { %s2014_s29 = scalar_select %p1659_p9, 1, 0 }
  0x1a   : > { %s2015_s30 = scalar_select %p1663_p10, 1, 0 }
  0x1b   : > { %352 = sbr.rel (%p2002_p11) target bundleno = 136 (0x88), region = 32 }
  0x1c   : > { %2016 = sst [smem:[#allocation22_spill]] %s2015_s30 }
  0x22   : > { %355 = sbr.rel (!%p1648_p5) target bundleno = 45 (0x2d), region = 36  ;;  %s357_s12 = sand.u32 (%p1648_p5), 1, %s1528_s19  }
  0x23   : > { %s1150_s13 = sshll.u32 (%p1648_p5), %s1532_s20, 2  ;;  %s1149_s14 = sshll.u32 (%p1648_p5), %s357_s12, 3 }
  0x24   : > { %s2017_s4 = sld [smem:[#allocation23_spill]] (%p1648_p5)  ;;  %s359_s25 = scalar_lea.vmem (%p1648_p5), [#allocation2], %s1149_s14 }
  0x2a   : > { %s361_s24 = scalar_lea.vmem %s2017_s4, %s1150_s13 }
  0x2b   : > { %v377_v0 = vld [vmem:[%s361_s24] sm:$0xf]  ;;  %v379_v1 = vld [vmem:[%s361_s24 + $0x8] sm:$0xf] }
  0x2c   : > { %378 = vst [vmem:[%s359_s25] sm:$0xf] %v377_v0  ;;  %380 = vst [vmem:[%s359_s25 + $0x4] sm:$0xf] %v379_v1 }
  0x2d PF: > { %s1678_s22 = sand.u32 1, %s1528_s19   ;;  %s428_s26 = sand.u32 1, %s1532_s20  }
  0x2e   : > { %s1153_s23 = sshll.u32 %s1678_s22, 2  ;;  %s1154_s12 = sshll.u32 %s1532_s20, 5 }
  0x2f   : > { %s432_s30 = scalar_lea.vmem [#allocation6], %s1153_s23  ;;  %s2018_s6 = sld [smem:[#allocation25_spill]] }
  0x30   : > { %s438_s17 = sshll.u32 %s432_s30, 4  ;;  %s1690_s14 = scalar_lea.sflag [#allocation7], %s428_s26  ;;  %s1688_s17 = int_to_ptr.vmem [resolvable:$true] %s438_s17 }
  0x35   : > { %s1686_s16 = scalar_lea.hbm %s2018_s6, %s1154_s12  ;;  %s1322_s25 = scalar_lea.hbm %s2018_s6, 128 }
  0x36   : > { %s1318_s24 = scalar_lea.hbm %s1686_s16, 64  ;;  %p1323_p1 = scmp.lt.u32.totalorder %s1686_s16, %s2018_s6 }
  0x37   : > { %p1319_p12 = scmp.ne.s32.totalorder %s1686_s16, %s1318_s24  ;;  %p1324_p2 = scmp.lt.u32.totalorder %s1322_s25, %s1318_s24 }
  0x38   : > { %p1326_p4 = scmp.lt.u32.totalorder %s1318_s24, %s1686_s16 }
  0x39   : > { %p1320_p13 = pnand %p1319_p12, %p1648_p5  ;;  %p1325_p3 = por %p1324_p2, %p1323_p1 }
  0x3b   : > { %p1321_p0 = pneg %p1320_p13  ;;  %p1327_p7 = por %p1326_p4, %p1325_p3 }
  0x3d   : > { %p1328_p8 = pnand %p1327_p7, %p1321_p0 }
  0x3f   : > { %1331 = shalt.err (!%p1328_p8)
}
  0x40   : > { %s1332_s26 = scalar_lea.vmem %s1688_s17, 64  ;;  %s1534_s13 = smov [#allocation6]  }
  0x41   : > { %p1333_p12 = scmp.ne.s32.totalorder %s1688_s17, %s1332_s26  ;;  %s1336_s23 = sshll.u32 %s1534_s13, 4  ;;  %s1337_s23 = int_to_ptr.vmem [resolvable:$false] %s1336_s23 }
  0x42   : > { %s1338_s30 = scalar_lea.vmem %s1337_s23, 128  ;;  %p1339_p10 = scmp.lt.s32.totalorder %s1688_s17, %s1337_s23 }
  0x43   : > { %p1334_p13 = pnand %p1333_p12, %p1648_p5  ;;  %p1340_p9 = scmp.lt.s32.totalorder %s1338_s30, %s1332_s26 }
  0x45   : > { %p1335_p11 = pneg %p1334_p13  ;;  %p1341_p1 = por %p1340_p9, %p1339_p10 }
  0x47   : > { %p1342_p2 = pnand %p1341_p1, %p1335_p11 }
  0x49   : > { %1345 = shalt.err (!%p1342_p2)
}
  0x4a   : > { %s1535_s24 = smov 64   ;;  %s1536_s25 = smov 32  }
  0x4b   : > { %s1537_s15 = smov 2   ;;  %s1716_s12 = sshll.u32 %s1678_s22, 3 }
  0x4c   : > { %1249 = dma.hbm_to_vmem [thread:$0]  (%p1648_p5), %s1686_s16, 64, %s1688_s17, %s1690_s14, %s1535_s24, %s1536_s25, %s1537_s15  }
  0x4d   : > { %s1152_s26 = sshll.u32 %s1532_s20, 6  ;;  %s2019_s5 = sld [smem:[#allocation24_spill]] }
  0x4e   : > { %s412_s4 = scalar_lea.vmem [#allocation3], %s1716_s12  ;;  %s409_s19 = scalar_lea.sflag [#allocation4], %s1678_s22 }
  0x4f   : > { %s418_s6 = sshll.u32 %s412_s4, 4  ;;  %s1727_s6 = int_to_ptr.vmem [resolvable:$true] %s418_s6 }
  0x53   : > { %s1724_s30 = scalar_lea.hbm %s2019_s5, %s1152_s26  ;;  %s1350_s15 = scalar_lea.hbm %s2019_s5, 256 }
  0x54   : > { %s1346_s17 = scalar_lea.hbm %s1724_s30, 128  ;;  %p1351_p0 = scmp.lt.u32.totalorder %s1724_s30, %s2019_s5 }
  0x55   : > { %p1347_p9 = scmp.ne.s32.totalorder %s1724_s30, %s1346_s17  ;;  %p1352_p3 = scmp.lt.u32.totalorder %s1350_s15, %s1346_s17 }
  0x56   : > { %p1354_p7 = scmp.lt.u32.totalorder %s1346_s17, %s1724_s30 }
  0x57   : > { %p1348_p10 = pnand %p1347_p9, %p1648_p5  ;;  %p1353_p4 = por %p1352_p3, %p1351_p0 }
  0x59   : > { %p1349_p11 = pneg %p1348_p10  ;;  %p1355_p8 = por %p1354_p7, %p1353_p4 }
  0x5b   : > { %p1356_p12 = pnand %p1355_p8, %p1349_p11 }
  0x5d   : > { %1359 = shalt.err (!%p1356_p12)
}
  0x5e   : > { %s1360_s4 = scalar_lea.vmem %s1727_s6, 128  ;;  %s1538_s16 = smov [#allocation3]  }
  0x5f   : > { %p1361_p13 = scmp.ne.s32.totalorder %s1727_s6, %s1360_s4  ;;  %s1364_s25 = sshll.u32 %s1538_s16, 4  ;;  %s1365_s25 = int_to_ptr.vmem [resolvable:$false] %s1364_s25 }
  0x60   : > { %s1366_s13 = scalar_lea.vmem %s1365_s25, 256  ;;  %p1367_p9 = scmp.lt.s32.totalorder %s1727_s6, %s1365_s25 }
  0x61   : > { %p1362_p1 = pnand %p1361_p13, %p1648_p5  ;;  %p1368_p10 = scmp.lt.s32.totalorder %s1366_s13, %s1360_s4 }
  0x63   : > { %p1363_p2 = pneg %p1362_p1  ;;  %p1369_p0 = por %p1368_p10, %p1367_p9 }
  0x65   : > { %p1370_p3 = pnand %p1369_p0, %p1363_p2 }
  0x67   : > { %1373 = shalt.err (!%p1370_p3)
}
  0x68   : > { %s1539_s17 = smov 128   ;;  %s1540_s15 = smov 4  }
  0x69   : > { %1248 = dma.hbm_to_vmem [thread:$0]  (%p1648_p5), %s1724_s30, 128, %s1727_s6, %s409_s19, %s1539_s17, %s1535_s24, %s1540_s15  }
  0x6a   : > { %s1761_s16 = scalar_lea.hbm %s1992_s7, %s1152_s26  ;;  %s452_s25 = scalar_lea.vmem [#allocation8], %s1716_s12 }
  0x6b   : > { %s458_s13 = sshll.u32 %s452_s25, 4  ;;  %s1374_s5 = scalar_lea.hbm %s1761_s16, 128  ;;  %s1764_s13 = int_to_ptr.vmem [resolvable:$true] %s458_s13 }
  0x6c   : > { %p1375_p11 = scmp.ne.s32.totalorder %s1761_s16, %s1374_s5  ;;  %s1378_s22 = scalar_lea.hbm %s1992_s7, 256 }
  0x6d   : > { %p1379_p8 = scmp.lt.u32.totalorder %s1761_s16, %s1992_s7  ;;  %p1380_p12 = scmp.lt.u32.totalorder %s1378_s22, %s1374_s5 }
  0x6e   : > { %p1376_p4 = pnand %p1375_p11, %p1648_p5  ;;  %p1382_p1 = scmp.lt.u32.totalorder %s1374_s5, %s1761_s16 }
  0x6f   : > { %p1381_p13 = por %p1380_p12, %p1379_p8 }
  0x70   : > { %p1377_p7 = pneg %p1376_p4 }
  0x71   : > { %p1383_p2 = por %p1382_p1, %p1381_p13 }
  0x73   : > { %p1384_p9 = pnand %p1383_p2, %p1377_p7 }
  0x75   : > { %1387 = shalt.err (!%p1384_p9)
}
  0x76   : > { %s1388_s23 = scalar_lea.vmem %s1764_s13, 128  ;;  %s1541_s4 = smov [#allocation8]  }
  0x77   : > { %p1389_p10 = scmp.ne.s32.totalorder %s1764_s13, %s1388_s23  ;;  %s1392_s25 = sshll.u32 %s1541_s4, 4  ;;  %s1393_s25 = int_to_ptr.vmem [resolvable:$false] %s1392_s25 }
  0x78   : > { %s1394_s6 = scalar_lea.vmem %s1393_s25, 256  ;;  %p1395_p11 = scmp.lt.s32.totalorder %s1764_s13, %s1393_s25 }
  0x79   : > { %p1390_p0 = pnand %p1389_p10, %p1648_p5  ;;  %p1396_p4 = scmp.lt.s32.totalorder %s1394_s6, %s1388_s23 }
  0x7b   : > { %p1391_p3 = pneg %p1390_p0  ;;  %p1397_p8 = por %p1396_p4, %p1395_p11 }
  0x7d   : > { %p1398_p12 = pnand %p1397_p8, %p1391_p3 }
  0x7f   : > { %1401 = shalt.err (!%p1398_p12)
}
  0x80   : > { %1250 = dma.hbm_to_vmem [thread:$0]  (%p1648_p5), %s1761_s16, 128, %s1764_s13, %s1690_s14, %s1539_s17, %s1535_s24, %s1540_s15  }
  0x81   : > { %467 = sbr.rel (!%p1648_p5) target bundleno = 136 (0x88), region = 89  ;;  %s1158_s5 = sshll.u32 (%p1648_p5), %s1532_s20, 2 }
  0x82   : > { %s473_s30 = scalar_lea.vmem (%p1648_p5), %s1993_s8, %s1158_s5  ;;  %s471_s26 = scalar_lea.vmem (%p1648_p5), [#allocation9], %s1716_s12 }
  0x83   : > { %v489_v2 = vld [vmem:[%s473_s30] sm:$0xf] (%p1648_p5)  ;;  %v491_v3 = vld [vmem:[%s473_s30 + $0x8] sm:$0xf] (%p1648_p5) }
  0x84   : > { %490 = vst [vmem:[%s471_s26] sm:$0xf] (%p1648_p5), %v489_v2  ;;  %492 = vst [vmem:[%s471_s26 + $0x4] sm:$0xf] (%p1648_p5), %v491_v3 }
  0x88 PF: > { %p1159_p7 = scmp.ge.s32.totalorder %s1532_s20, 1  ;;  %p518_p13 = scmp.lt.s32.totalorder %s1532_s20, 3 }
  0x8a   : > { %p519_p1 = pnand %p1159_p7, %p518_p13 }
  0x8b   : > { %s1801_s27 = sand.u32 (!%p519_p1), 1, %s1524_s18  }
  0x8c   : > { %522 = sbr.rel (%p519_p1) target bundleno = 566 (0x236), region = 130  ;;  %s1804_s14 = sshll.u32 (!%p519_p1), %s1801_s27, 3 }
  0x8d   : > { %s527_s24 = scalar_lea.vmem (!%p519_p1), [#allocation2], %s1804_s14  ;;  %s532_s12 = scalar_lea.sflag (!%p519_p1), [#allocation4], %s1801_s27 }
  0x8e   : > { %s535_s17 = scalar_lea.vmem (!%p519_p1), [#allocation3], %s1804_s14 }
  0x93   : > { %1503 = dma.done.wait (%p1652_p6), %s532_s12, 128  }
  0x94   : > { %1505 = vsyncadd (%p1652_p6), %s532_s12, 4294967168  ;;  %s540_s15 = sand.u32 1, %s1630_s21   ;;  %s1162_s16 = sshll.u32 %s1801_s27, 2 }
  0x95   : > { %s541_s13 = scalar_lea.sflag [#allocation7], %s540_s15  ;;  %s544_s23 = scalar_lea.vmem [#allocation6], %s1162_s16 }
  0x96   : > { %1507 = dma.done.wait (%p1652_p6), %s541_s13, 192  }
  0x97   : > { %1509 = vsyncadd (%p1652_p6), %s541_s13, 4294967104  ;;  %v1542_v4 = vmov 0   ;;  %v664_v5 = vld [vmem:[%s1986_s1] sm:$0xff]  ;;  %v665_v7 = vld [vmem:[%s1986_s1 + $0x8] sm:$0xff]  ;;  %vm694_vm0 = vcmask 130048   ;;  %s612_s4 = scalar_lea.vmem [#allocation10], %s1804_s14 }
  0x98   : > { %1313 = vset.pattern.permute.xlu1 %v1542_v4  ;;  %1312 = vset.pattern.permute.xlu0 %v1542_v4  ;;  %v650_v6 = vld [vmem:[%s1985_s0] sm:$0xff]  ;;  %v651_v9 = vld [vmem:[%s1985_s0 + $0x8] sm:$0xff]  ;;  %v1191_v11 = vld [vmem:[%s535_s17] sm:$0xff]   ;;  %s909_s5 = sshll.u32 %s612_s4, 4  ;;  %s1177_s19 = sshll.u32 %s1630_s21, 6  ;;  %s1859_s5 = int_to_ptr.vmem [resolvable:$true] %s909_s5 }
  0x99   : > { %668 = vperm.xlu1 %1313, %v664_v5   ;;  %654 = vperm.xlu0 %1312, %v650_v6   ;;  %v1187_v8 = vld [vmem:[%s527_s24] sm:$0xff]   ;;  %v1192_v14 = vunpack.c.l.bf16 %v1191_v11  ;;  %v1193_v16 = vunpack.c.h.bf16 %v1191_v11  ;;  %s1867_s30 = scalar_lea.hbm %s1994_s9, %s1177_s19  ;;  %s888_s26 = scalar_lea.sflag [#allocation5], %s1801_s27 }
  0x9a   : > { %v1188_v10 = vunpack.c.l.bf16 %v1187_v8  ;;  %v1213_v12 = vld [vmem:[%s544_s23] sm:$0xf]   ;;  %v1189_v13 = vunpack.c.h.bf16 %v1187_v8  ;;  %v693_v29 = vld [vmem:[%s1988_s3 + $0x8] sm:$0xff]  ;;  %s553_s23 = scalar_lea.vmem [#allocation8], %s1804_s14  ;;  %s1402_s24 = scalar_lea.vmem %s1859_s5, 128 }
  0x9b   : > { %v1214_v15 = vunpack.c.0.s8 %v1213_v12  ;;  %v1215_v17 = vunpack.c.1.s8 %v1213_v12  ;;  %v692_v27 = vld [vmem:[%s1988_s3] sm:$0xff]  ;;  %v1846_v30 = vld [vmem:[%s553_s23] sm:$0xff]   ;;  %p1403_p5 = scmp.ne.s32.totalorder %s1859_s5, %s1402_s24  ;;  %p2020_p6 = scmp.ne.s32.totalorder %s2014_s29, 0 }
  0x9c   : > { %v644_v19 = vsub.f32 %v1188_v10, %v1192_v14  ;;  %v645_v20 = vsub.f32 %v1189_v13, %v1193_v16  ;;  %v690_v28 = vld [vmem:[%s1987_s2] sm:$0xff]  ;;  %1228 = vmatprep.mubr.msk.f32.mxu1 %vm694_vm0, %v692_v27  ;;  %v1196_v31 = vunpack.c.l.bf16 %v1846_v30  ;;  %v1197_v34 = vunpack.c.h.bf16 %v1846_v30  ;;  %v691_v44 = vld [vmem:[%s1987_s2 + $0x8] sm:$0xff]  ;;  %s1543_s12 = smov [#allocation10]  }
  0x9d   : > { %673 = vperm.xlu1 %1313, %v665_v7   ;;  %659 = vperm.xlu0 %1312, %v651_v9   ;;  %v638_v18 = vcvt.s32.f32 %v1214_v15  ;;  %v639_v21 = vcvt.s32.f32 %v1215_v17  ;;  %p1404_p2 = pnand %p1403_p5, %p2020_p6  ;;  %s1406_s17 = sshll.u32 %s1543_s12, 4  ;;  %s1407_s17 = int_to_ptr.vmem [resolvable:$false] %s1406_s17 }
  0x9e   : > { %1235 = vmatprep.mubr.msk.f32.mxu0 %vm694_vm0, %v690_v28  ;;  %s1408_s16 = scalar_lea.vmem %s1407_s17, 256  ;;  %p1409_p10 = scmp.lt.s32.totalorder %s1859_s5, %s1407_s17 }
  0x9f   : > { %v646_v22 = vmul.f32 %v644_v19, %v638_v18  ;;  %v648_v23 = vmul.f32 %v1192_v14, %v638_v18  ;;  %v647_v24 = vmul.f32 %v645_v20, %v639_v21  ;;  %v649_v25 = vmul.f32 %v1193_v16, %v639_v21  ;;  %p1405_p9 = pneg %p1404_p2  ;;  %p1410_p0 = scmp.lt.s32.totalorder %s1408_s16, %s1402_s24 }
  0xa1   : > { %v1238_v26 = vpack.c.bf16 %v649_v25, %v648_v23  ;;  %p1411_p3 = por %p1410_p0, %p1409_p10 }
  0xa3   : > { %1239 = vmatprep.subr.bf16.mxu1 %v1238_v26  ;;  %p1412_p11 = pnand %p1411_p3, %p1405_p9 }
  0xa4   : > { %1241 = vmatpush3.bf16.msra.mxu1 %v1238_v26 }
  0xa7   : > { %1229 = vmatmul.mubr.msk.f32.vlgmr.msra.gmra.mrb[0].mxu1 %vm694_vm0, %v693_v29 }
 0x118   : > { %v669_v32 = vpop.permute.xlu1 %668  ;;  %v655_v33 = vpop.permute.xlu0 %654 }
 0x119   : > { %v676_v35 = vmul.f32 %v1196_v31, %v669_v32  ;;  %v662_v36 = vmul.f32 %v655_v33, %v646_v22 }
 0x11b   : > { %v678_v41 = vadd.f32 %v676_v35, %v662_v36 }
 0x11c   : > { %v674_v37 = vpop.permute.xlu1 %673  ;;  %v660_v38 = vpop.permute.xlu0 %659 }
 0x11d   : > { %v677_v39 = vmul.f32 %v1197_v34, %v674_v37  ;;  %v663_v40 = vmul.f32 %v660_v38, %v647_v24 }
 0x11f   : > { %v679_v42 = vadd.f32 %v677_v39, %v663_v40 }
 0x121   : > { %v1201_v43 = vpack.c.bf16 %v679_v42, %v678_v41 }
 0x123   : > { %1202 = vst [vmem:[%s612_s4] sm:$0xff] %v1201_v43   ;;  %1243 = vmatprep.subr.bf16.mxu0 %v1201_v43 }
 0x124   : > { %1245 = vmatpush3.bf16.msra.mxu0 %v1201_v43 }
 0x127   : > { %1236 = vmatmul.mubr.msk.f32.vlgmr.msra.gmra.mrb[0].mxu0 %vm694_vm0, %v691_v44 }
 0x17a   : > { %v1230_v45 = vpop.f32.mrb[0].mxu1 }
 0x17b   : > { %v767_v46 = vpop.f32.mrb[1].mxu1 }
 0x17c   : > { %1415 = shalt.err (!%p1412_p11)
}
 0x17d   : > { %s1416_s13 = scalar_lea.hbm %s1867_s30, 128  ;;  %s1420_s25 = scalar_lea.hbm %s1994_s9, 256 }
 0x17e   : > { %p1417_p4 = scmp.ne.s32.totalorder %s1867_s30, %s1416_s13  ;;  %p1421_p7 = scmp.lt.u32.totalorder %s1867_s30, %s1994_s9 }
 0x17f   : > { %p1422_p13 = scmp.lt.u32.totalorder %s1420_s25, %s1416_s13  ;;  %p1424_p5 = scmp.lt.u32.totalorder %s1416_s13, %s1867_s30 }
 0x180   : > { %p1418_p8 = pnand %p1417_p4, %p2020_p6 }
 0x181   : > { %p1423_p1 = por %p1422_p13, %p1421_p7 }
 0x182   : > { %p1419_p12 = pneg %p1418_p8 }
 0x183   : > { %p1425_p2 = por %p1424_p5, %p1423_p1 }
 0x185   : > { %p1426_p9 = pnand %p1425_p2, %p1419_p12 }
 0x187   : > { %1429 = shalt.err (!%p1426_p9)
}
 0x188   : > { %s1544_s28 = smov 64   ;;  %s1545_s24 = smov 128  }
 0x189   : > { %s1546_s12 = smov 4   ;;  %s561_s17 = scalar_lea.vmem [#allocation9], %s1804_s14 }
 0x18a   : > { %1254 = dma.vmem_to_hbm [thread:$0]  (%p2020_p6), %s1859_s5, 128, %s1867_s30, %s888_s26, %s1544_s28, %s1545_s24, %s1546_s12  }
 0x18b   : > { %v1204_v47 = vld [vmem:[%s561_s17] sm:$0xff]   ;;  %s619_s16 = scalar_lea.vmem [#allocation11], %s1804_s14  ;;  %s1907_s26 = scalar_lea.hbm %s1995_s10, %s1177_s19 }
 0x18c   : > { %v1206_v48 = vunpack.c.h.bf16 %v1204_v47  ;;  %v1205_v50 = vunpack.c.l.bf16 %v1204_v47  ;;  %s924_s13 = sshll.u32 %s619_s16, 4  ;;  %s1913_s14 = scalar_lea.sflag [#allocation12], %s540_s15  ;;  %s1909_s13 = int_to_ptr.vmem [resolvable:$true] %s924_s13 }
 0x18d   : > { %s1430_s23 = scalar_lea.vmem %s1909_s13, 128  ;;  %s1547_s4 = smov [#allocation11]  }
 0x18e   : > { %p1431_p10 = scmp.ne.s32.totalorder %s1909_s13, %s1430_s23  ;;  %s1434_s25 = sshll.u32 %s1547_s4, 4  ;;  %s1435_s25 = int_to_ptr.vmem [resolvable:$false] %s1434_s25 }
 0x18f   : > { %s1436_s19 = scalar_lea.vmem %s1435_s25, 256  ;;  %p1437_p11 = scmp.lt.s32.totalorder %s1909_s13, %s1435_s25 }
 0x190   : > { %p1432_p0 = pnand %p1431_p10, %p2020_p6  ;;  %p1438_p4 = scmp.lt.s32.totalorder %s1436_s19, %s1430_s23 }
 0x192   : > { %p1433_p3 = pneg %p1432_p0  ;;  %p1439_p8 = por %p1438_p4, %p1437_p11 }
 0x194   : > { %p1440_p12 = pnand %p1439_p8, %p1433_p3 }
 0x1fa   : > { %v1237_v49 = vpop.f32.mrb[0].mxu0 }
 0x1fb   : > { %v854_v51 = vadd.f32 %v1237_v49, %v1230_v45  ;;  %v848_v52 = vpop.f32.mrb[1].mxu0 }
 0x1fc   : > { %v849_v53 = vadd.f32 %v848_v52, %v767_v46 }
 0x1fd   : > { %v862_v54 = vadd.f32 %v1206_v48, %v854_v51 }
 0x1fe   : > { %v861_v55 = vadd.f32 %v1205_v50, %v849_v53 }
 0x1ff   : > { %1314 = vtanh.f32 %v862_v54 }
 0x200   : > { %1316 = vtanh.f32 %v861_v55 }
 0x209   : > { %v1315_v56 = vpop.eup %1314 }
 0x20a   : > { %v1317_v57 = vpop.eup %1316  ;;  %v876_v58 = vsub.f32 %v1197_v34, %v1315_v56 }
 0x20b   : > { %v1210_v59 = vpack.c.bf16 %v1315_v56, %v1317_v57  ;;  %v875_v60 = vsub.f32 %v1196_v31, %v1317_v57 }
 0x20c   : > { %v878_v61 = vand.u32 2147483647, %v876_v58 }
 0x20d   : > { %v877_v62 = vand.u32 2147483647, %v875_v60  ;;  %1211 = vst [vmem:[%s619_s16] sm:$0xff] %v1210_v59  }
 0x20e   : > { %1443 = shalt.err (!%p1440_p12)
}
 0x20f   : > { %s1444_s15 = scalar_lea.hbm %s1907_s26, 128  ;;  %s1448_s17 = scalar_lea.hbm %s1995_s10, 256 }
 0x210   : > { %p1445_p7 = scmp.ne.s32.totalorder %s1907_s26, %s1444_s15  ;;  %p1449_p5 = scmp.lt.u32.totalorder %s1907_s26, %s1995_s10 }
 0x211   : > { %p1450_p2 = scmp.lt.u32.totalorder %s1448_s17, %s1444_s15  ;;  %p1452_p10 = scmp.lt.u32.totalorder %s1444_s15, %s1907_s26 }
 0x212   : > { %p1446_p13 = pnand %p1445_p7, %p2020_p6 }
 0x213   : > { %p1451_p9 = por %p1450_p2, %p1449_p5 }
 0x214   : > { %p1447_p1 = pneg %p1446_p13 }
 0x215   : > { %p1453_p0 = por %p1452_p10, %p1451_p9 }
 0x217   : > { %p1454_p3 = pnand %p1453_p0, %p1447_p1 }
 0x219   : > { %1457 = shalt.err (!%p1454_p3)
}
 0x21a   : > { %1255 = dma.vmem_to_hbm [thread:$0]  (%p2020_p6), %s1909_s13, 128, %s1907_s26, %s1913_s14, %s1544_s28, %s1545_s24, %s1546_s12   ;;  %v879_v63 = vadd.f32 %v878_v61, %v877_v62 }
 0x21b   : > { %s1179_s30 = sshll.u32 %s1630_s21, 4  ;;  %s625_s23 = scalar_lea.vmem [#allocation13], %s1801_s27 }
 0x21c   : > { %v880_v0 = vrot.slane %v879_v63, 4  ;;  %s940_s4 = sshll.u32 %s625_s23, 4  ;;  %s1945_s15 = scalar_lea.hbm %s1996_s11, %s1179_s30  ;;  %s941_s4 = int_to_ptr.vmem [resolvable:$true] %s940_s4 }
 0x21d   : > { %s1458_s6 = scalar_lea.vmem %s941_s4, 16  ;;  %s1548_s28 = smov [#allocation13]  }
 0x21e   : > { %v881_v1 = vadd.f32 %v880_v0, %v879_v63  ;;  %p1459_p11 = scmp.ne.s32.totalorder %s941_s4, %s1458_s6  ;;  %s1462_s24 = sshll.u32 %s1548_s28, 4  ;;  %s1463_s24 = int_to_ptr.vmem [resolvable:$false] %s1462_s24 }
 0x21f   : > { %s1464_s21 = scalar_lea.vmem %s1463_s24, 32  ;;  %p1465_p12 = scmp.lt.s32.totalorder %s941_s4, %s1463_s24 }
 0x220   : > { %v882_v2 = vrot.slane %v881_v1, 2  ;;  %p1460_p4 = pnand %p1459_p11, %p2020_p6  ;;  %p1466_p7 = scmp.lt.s32.totalorder %s1464_s21, %s1458_s6 }
 0x222   : > { %v883_v3 = vadd.f32 %v882_v2, %v881_v1  ;;  %p1461_p8 = pneg %p1460_p4  ;;  %p1467_p13 = por %p1466_p7, %p1465_p12 }
 0x224   : > { %v884_v4 = vrot.slane %v883_v3, 1  ;;  %p1468_p1 = pnand %p1467_p13, %p1461_p8 }
 0x226   : > { %v885_v5 = vadd.f32 %v884_v4, %v883_v3 }
 0x228   : > { %886 = vst [vmem:[%s625_s23] sm:$0x1] %v885_v5 }
 0x229   : > { %1471 = shalt.err (!%p1468_p1)
}
 0x22a   : > { %s1472_s27 = scalar_lea.hbm %s1945_s15, 16  ;;  %s1476_s26 = scalar_lea.hbm %s1996_s11, 32 }
 0x22b   : > { %p1473_p5 = scmp.ne.s32.totalorder %s1945_s15, %s1472_s27  ;;  %p1477_p10 = scmp.lt.u32.totalorder %s1945_s15, %s1996_s11 }
 0x22c   : > { %p1478_p0 = scmp.lt.u32.totalorder %s1476_s26, %s1472_s27  ;;  %p1480_p11 = scmp.lt.u32.totalorder %s1472_s27, %s1945_s15 }
 0x22d   : > { %p1474_p2 = pnand %p1473_p5, %p2020_p6 }
 0x22e   : > { %p1479_p3 = por %p1478_p0, %p1477_p10 }
 0x22f   : > { %p1475_p9 = pneg %p1474_p2 }
 0x230   : > { %p1481_p4 = por %p1480_p11, %p1479_p3 }
 0x232   : > { %p1482_p8 = pnand %p1481_p4, %p1475_p9 }
 0x234   : > { %1485 = shalt.err (!%p1482_p8)
}
 0x235   : > { %1256 = dma.vmem_to_hbm [thread:$0]  (%p2020_p6), %s941_s4, 16, %s1945_s15, %s1913_s14  }
 0x236 PF: > { %s2021_s16 = sld [smem:[#allocation18_spill]]  ;;  %s2022_s5 = sld [smem:[#allocation22_spill]] }
 0x237   : > { %p2024_p7 = scmp.ge.s32.totalorder %s1532_s20, 2 }
 0x23c   : > { %s952_s30 = sand.u32 1, %s2021_s16   ;;  %p2023_p12 = scmp.ne.s32.totalorder %s2022_s5, 0 }
 0x23d   : > { %s953_s23 = scalar_lea.sflag [#allocation5], %s952_s30 }
 0x23e   : > { %p1261_p13 = pnand %p2024_p7, %p2023_p12 }
 0x240   : > { %1511 = dma.done.wait (!%p1261_p13), %s953_s23, 128  }
 0x241   : > { %1513 = vsyncadd (!%p1261_p13), %s953_s23, 4294967168  ;;  %s2025_s25 = sadd.s32 4294967294, %s1532_s20  }
 0x242   : > { %s961_s19 = sand.u32 1, %s2025_s25  }
 0x243   : > { %s962_s6 = scalar_lea.sflag [#allocation12], %s961_s19 }
 0x244   : > { %1515 = dma.done.wait (!%p1261_p13), %s962_s6, 144  }
 0x245   : > { %1517 = vsyncadd (!%p1261_p13), %s962_s6, 4294967152  ;;  %s2026_s20 = sld [smem:[#allocation20_spill]]  ;;  %s2027_s29 = sld [smem:[#allocation19_spill]] }
 0x246   : > { %s2028_s19 = sld [smem:[#allocation21_spill]]  ;;  %s2029_s17 = smov %s1524_s18 }
 0x24b   : > { %p31_p6 = scmp.ge.s32.totalorder %s2026_s20, 4   ;;  %s2030_s18 = smov %s2027_s29 }
 0x24d   :  { %33 = sbr.rel (!%p31_p6) target bundleno = 13 (0xd), region = 255 }
 0x254   :  { %975 = vsyncpa [#allocation4], 1 }
 0x255   :  { %977 = vsyncpa [#allocation4 + $0x1], 1 }
 0x256   :  { %978 = vsyncpa [#allocation7], 1 }
 0x257   :  { %980 = vsyncpa [#allocation7 + $0x1], 1 }
 0x258   :  { %981 = vsyncpa [#allocation5], 1 }
 0x259   :  { %983 = vsyncpa [#allocation5 + $0x1], 1 }
 0x25a   :  { %984 = vsyncpa [#allocation12], 1 }
 0x25b   :  { %986 = vsyncpa [#allocation12 + $0x1], 1 }

</bundles_post_ra>
